<compile_context>
chip_gen: v6e
topology: v6e:2x2x1
jax: 0.10.0
libtpu: 0.0.40
codegen_flags: <defaults>
</compile_context>

<pallas_src>
import numpy as np
import jax
import jax.numpy as jnp
from jax.experimental import pallas as pl
from jax.experimental.pallas import tpu as pltpu

BN_EPS = 1e-5  # torch.nn.BatchNorm1d default eps


def make_dcn_kernel(num_cross, num_fc):
    def kernel(*refs):
        idx = 0
        x_ref = refs[idx]; idx += 1            # (D, TB)  f32, batch on lanes
        cw_ref = refs[idx]; idx += 1           # (Lc, D)  cross weights
        cbt_ref = refs[idx]; idx += 1          # (D, Lc)  cross biases (transposed)
        mlp_refs = []
        for _ in range(num_fc):
            mlp_refs.append(refs[idx:idx + 2])  # (H_out, H_in) weight, (H_out, 1) bias
            idx += 2
        wc_ref = refs[idx]; idx += 1           # (1, D)       final weight (cross part)
        wm_ref = refs[idx]; idx += 1           # (1, H_last)  final weight (mlp part)
        lb_ref = refs[idx]; idx += 1           # (1, 1)       final bias
        out_ref = refs[idx]                    # (1, TB)

        x0 = x_ref[...]                        # (D, TB) f32

        # ---------------- Cross network -------------------------------------
        # x_{l+1} = x0 * (w_l . x_l) + b_l + x_l
        # The per-sample dot runs on the MXU as (1, D) @ (D, TB) -> (1, TB).
        xc = x0
        for l in range(num_cross):
            w_row = cw_ref[l:l + 1, :]                                     # (1, D)
            b_col = cbt_ref[:, l:l + 1]                                    # (D, 1)
            xw = jnp.dot(w_row, xc, preferred_element_type=jnp.float32)   # (1, TB)
            xc = x0 * xw + b_col + xc

        # ------------- MLP: (Linear+BN folded) -> ReLU -> Dropout(eval) -----
        h = x0
        for (w_ref, b_ref) in mlp_refs:
            w = w_ref[...]                                                 # (H_out, H_in)
            h = jnp.dot(w, h.astype(w.dtype),
                        preferred_element_type=jnp.float32) + b_ref[...]
            h = jnp.maximum(h, 0.0)

        # ------------- Final linear on concat([cross, mlp]) + sigmoid -------
        wc = wc_ref[...]                                                   # (1, D)
        wm = wm_ref[...]                                                   # (1, H_last)
        y = (jnp.dot(wc, xc.astype(wc.dtype), preferred_element_type=jnp.float32)
             + jnp.dot(wm, h.astype(wm.dtype), preferred_element_type=jnp.float32)
             + lb_ref[...])                                                # (1, TB)
        out_ref[...] = jax.nn.sigmoid(y)

    return kernel


def dcn_forward_pallas(emb, cross_w, cross_b, mlp_params, lin_w, lin_b,
                       *, batch_tile=8192, use_bf16_matmul=True):
    """emb: (B, D) embedded+flattened features. Returns (B,) probabilities."""
    B, D = emb.shape
    num_cross = cross_w.shape[0]
    num_fc = len(mlp_params)
    H_last = mlp_params[-1][0].shape[1]
    mm_dtype = jnp.bfloat16 if use_bf16_matmul else jnp.float32

    # ---- host-side prep: fold BN into Linear, transpose, split final W -----
    mlp_args = []
    for (w, b, g, be, m, v) in mlp_params:
        scale = g * jax.lax.rsqrt(v + BN_EPS)          # (1, H_out)
        w_fold = w * scale                             # (H_in, H_out)
        b_fold = (b - m) * scale + be                  # (1, H_out)
        mlp_args.append(w_fold.T.astype(mm_dtype))     # (H_out, H_in)
        mlp_args.append(b_fold.T.astype(jnp.float32))  # (H_out, 1)
    wc = lin_w[:D, :].T.astype(mm_dtype)               # (1, D)
    wm = lin_w[D:D + H_last, :].T.astype(mm_dtype)     # (1, H_last)
    lb = lin_b.astype(jnp.float32)                     # (1, 1)

    # ---- lane-dense layout: batch on lanes, pad batch to a tile multiple ---
    if B <= batch_tile:
        TB, Bp = B, B                                  # single full-extent block
    else:
        TB = batch_tile                                # multiple of 128
        Bp = ((B + TB - 1) // TB) * TB
    x_t = emb.astype(jnp.float32).T                    # (D, B)
    if Bp != B:
        x_t = jnp.pad(x_t, ((0, 0), (0, Bp - B)))      # zero rows are harmless

    args = ([x_t,
             cross_w.astype(jnp.float32),              # (Lc, D)
             cross_b.astype(jnp.float32).T]            # (D, Lc)
            + mlp_args + [wc, wm, lb])

    in_specs = [pl.BlockSpec((D, TB), lambda i: (0, i))]
    in_specs += [pl.BlockSpec(a.shape, lambda i: (0, 0)) for a in args[1:]]
    out_spec = pl.BlockSpec((1, TB), lambda i: (0, i))

    out = pl.pallas_call(
        make_dcn_kernel(num_cross, num_fc),
        out_shape=jax.ShapeDtypeStruct((1, Bp), jnp.float32),
        grid=(Bp // TB,),
        in_specs=in_specs,
        out_specs=out_spec,
        compiler_params=pltpu.CompilerParams(
            dimension_semantics=("parallel",)),
    )(*args)
    return out[0, :B]                                  # == squeeze(1)


def dcn_forward_ref(emb, cross_w, cross_b, mlp_params, lin_w, lin_b):
    """Pure-JAX f32 reference of the same forward pass (unfolded params)."""
    x0 = emb
    xc = x0
    for l in range(cross_w.shape[0]):
        xw = jnp.sum(xc * cross_w[l][None, :], axis=-1, keepdims=True)
        xc = x0 * xw + cross_b[l][None, :] + xc
    h = x0
    for (w, b, g, be, m, v) in mlp_params:
        h = h @ w + b
        h = (h - m) * jax.lax.rsqrt(v + BN_EPS) * g + be
        h = jnp.maximum(h, 0.0)
    stacked = jnp.concatenate([xc, h], axis=1)
    y = stacked @ lin_w + lin_b
    return jax.nn.sigmoid(y)[:, 0]


def make_embedded(key, field_dims, output_dim, emb_table, offsets, B):
    """FeaturesEmbedding glue: categorical x -> (B, num_fields*output_dim)."""
    cols = []
    for j, fd in enumerate(field_dims):
        kj = jax.random.fold_in(key, j)
        cols.append(jax.random.randint(kj, (B, 1), 0, fd, dtype=jnp.int32))
    x = jnp.concatenate(cols, axis=1)                       # (B, num_fields)
    return emb_table[x + offsets[None, :]].reshape(B, -1)   # (B, D)


if __name__ == "__main__":
    # Small, module-consistent shapes.
    field_dims = [10, 20, 30, 40]       # 4 fields
    output_dim = 8                      # embedding dim per field
    cross_layers = 3
    fc_dims = [64, 32]
    B = 8
    num_fields = len(field_dims)
    D = num_fields * output_dim         # 32

    key = jax.random.PRNGKey(0)
    keys = jax.random.split(key, 32)
    ki = iter(keys)

    # FeaturesEmbedding: shared table + per-field offsets (glue, plain JAX).
    offsets = jnp.array(np.concatenate(([0], np.cumsum(field_dims)[:-1])),
                        dtype=jnp.int32)
    emb_table = jax.random.normal(next(ki), (sum(field_dims), output_dim),
                                  dtype=jnp.float32) * 0.1
    embedded = make_embedded(next(ki), field_dims, output_dim,
                             emb_table, offsets, B)          # (B, D)

    # CrossNetwork parameters.
    cross_w = jax.random.normal(next(ki), (cross_layers, D), jnp.float32) * 0.1
    cross_b = jax.random.normal(next(ki), (cross_layers, D), jnp.float32) * 0.1

    # MLP parameters: (w, b, gamma, beta, running_mean, running_var) per layer.
    mlp_params = []
    in_dim = D
    for h_dim in fc_dims:
        w = jax.random.normal(next(ki), (in_dim, h_dim), jnp.float32) * 0.1
        b = jax.random.normal(next(ki), (1, h_dim), jnp.float32) * 0.1
        gamma = jax.random.uniform(next(ki), (1, h_dim), jnp.float32, 0.5, 1.5)
        beta = jax.random.normal(next(ki), (1, h_dim), jnp.float32) * 0.1
        mean = jax.random.normal(next(ki), (1, h_dim), jnp.float32) * 0.1
        var = jax.random.uniform(next(ki), (1, h_dim), jnp.float32, 0.5, 1.5)
        mlp_params.append((w, b, gamma, beta, mean, var))
        in_dim = h_dim

    # Final linear: (D + fc_dims[-1]) -> 1.
    lin_w = jax.random.normal(next(ki), (D + fc_dims[-1], 1), jnp.float32) * 0.1
    lin_b = jax.random.normal(next(ki), (1, 1), jnp.float32) * 0.1

    ref = dcn_forward_ref(embedded, cross_w, cross_b, mlp_params, lin_w, lin_b)

    # 1) f32 matmul path: strict check.
    out_f32 = dcn_forward_pallas(embedded, cross_w, cross_b, mlp_params,
                                 lin_w, lin_b, use_bf16_matmul=False)
    out_f32 = jax.block_until_ready(out_f32)
    np.testing.assert_allclose(np.asarray(out_f32), np.asarray(ref),
                               rtol=1e-5, atol=1e-5)
    assert out_f32.shape == (B,)

    # 2) bf16 matmul path (MXU-native on v6e/v7x): looser tolerance.
    out_bf16 = dcn_forward_pallas(embedded, cross_w, cross_b, mlp_params,
                                  lin_w, lin_b, use_bf16_matmul=True)
    out_bf16 = jax.block_until_ready(out_bf16)
    np.testing.assert_allclose(np.asarray(out_bf16), np.asarray(ref),
                               rtol=2e-2, atol=2e-2)

    # 3) Larger ragged batch exercising the multi-step pipelined grid + padding.
    B2 = 300
    embedded2 = make_embedded(next(ki), field_dims, output_dim,
                              emb_table, offsets, B2)
    ref2 = dcn_forward_ref(embedded2, cross_w, cross_b, mlp_params, lin_w, lin_b)
    out2 = dcn_forward_pallas(embedded2, cross_w, cross_b, mlp_params,
                              lin_w, lin_b, batch_tile=128,
                              use_bf16_matmul=True)
    out2 = jax.block_until_ready(out2)
    assert out2.shape == (B2,)
    np.testing.assert_allclose(np.asarray(out2), np.asarray(ref2),
                               rtol=2e-2, atol=2e-2)

    print("KERNEL_OK")
</pallas_src>

<mosaic_0001>
module attributes {stable_mosaic.version = 11 : i64} {
  func.func @kernel(%arg0: i32, %arg1: memref<32x8xf32, #tpu.memory_space<vmem>>, %arg2: memref<3x32xf32, #tpu.memory_space<vmem>>, %arg3: memref<32x3xf32, #tpu.memory_space<vmem>>, %arg4: memref<64x32xf32, #tpu.memory_space<vmem>>, %arg5: memref<64x1xf32, #tpu.memory_space<vmem>>, %arg6: memref<32x64xf32, #tpu.memory_space<vmem>>, %arg7: memref<32x1xf32, #tpu.memory_space<vmem>>, %arg8: memref<1x32xf32, #tpu.memory_space<vmem>>, %arg9: memref<1x32xf32, #tpu.memory_space<vmem>>, %arg10: memref<1x1xf32, #tpu.memory_space<vmem>>, %arg11: memref<1x8xf32, #tpu.memory_space<vmem>>) attributes {dimension_semantics = [#tpu.dimension_semantics<parallel>], iteration_bounds = array<i64: 1>, scalar_prefetch = 0 : i64, scratch_operands = 0 : i64, tpu.core_type = #tpu.core_type<tc>, window_params = [{transform_indices = @transform_0, window_bounds = array<i64: 32, 8>}, {pipeline_mode = #tpu.pipeline_mode<synchronous>, transform_indices = @transform_1, window_bounds = array<i64: 3, 32>}, {pipeline_mode = #tpu.pipeline_mode<synchronous>, transform_indices = @transform_2, window_bounds = array<i64: 32, 3>}, {pipeline_mode = #tpu.pipeline_mode<synchronous>, transform_indices = @transform_3, window_bounds = array<i64: 64, 32>}, {pipeline_mode = #tpu.pipeline_mode<synchronous>, transform_indices = @transform_4, window_bounds = array<i64: 64, 1>}, {pipeline_mode = #tpu.pipeline_mode<synchronous>, transform_indices = @transform_5, window_bounds = array<i64: 32, 64>}, {pipeline_mode = #tpu.pipeline_mode<synchronous>, transform_indices = @transform_6, window_bounds = array<i64: 32, 1>}, {pipeline_mode = #tpu.pipeline_mode<synchronous>, transform_indices = @transform_7, window_bounds = array<i64: 1, 32>}, {pipeline_mode = #tpu.pipeline_mode<synchronous>, transform_indices = @transform_8, window_bounds = array<i64: 1, 32>}, {pipeline_mode = #tpu.pipeline_mode<synchronous>, transform_indices = @transform_9, window_bounds = array<i64: 1, 1>}, {transform_indices = @transform_10, window_bounds = array<i64: 1, 8>}]} {
    %c0 = arith.constant 0 : index
    %c0_0 = arith.constant 0 : index
    %0 = vector.load %arg1[%c0, %c0_0] : memref<32x8xf32, #tpu.memory_space<vmem>>, vector<32x8xf32>
    %c0_1 = arith.constant 0 : index
    %c0_2 = arith.constant 0 : index
    %1 = vector.load %arg2[%c0_1, %c0_2] : memref<3x32xf32, #tpu.memory_space<vmem>>, vector<1x32xf32>
    %c0_3 = arith.constant 0 : index
    %c0_4 = arith.constant 0 : index
    %2 = vector.load %arg3[%c0_3, %c0_4] : memref<32x3xf32, #tpu.memory_space<vmem>>, vector<32x1xf32>
    %cst = arith.constant dense<0.000000e+00> : vector<1x8xf32>
    %3 = tpu.matmul %1, %0, %cst {dimension_numbers = #tpu.dot_dimension_numbers<[1], [0], [0], [1], [0, 0, 1, 1], [], []>} : vector<1x32xf32>, vector<32x8xf32>, vector<1x8xf32> -> vector<1x8xf32>
    %4 = vector.broadcast %3 : vector<1x8xf32> to vector<32x8xf32>
    %5 = arith.mulf %0, %4 : vector<32x8xf32>
    %6 = vector.broadcast %2 : vector<32x1xf32> to vector<32x8xf32>
    %7 = arith.addf %5, %6 : vector<32x8xf32>
    %8 = arith.addf %7, %0 : vector<32x8xf32>
    %c1 = arith.constant 1 : index
    %c0_5 = arith.constant 0 : index
    %9 = vector.load %arg2[%c1, %c0_5] : memref<3x32xf32, #tpu.memory_space<vmem>>, vector<1x32xf32>
    %c0_6 = arith.constant 0 : index
    %c1_7 = arith.constant 1 : index
    %10 = vector.load %arg3[%c0_6, %c1_7] : memref<32x3xf32, #tpu.memory_space<vmem>>, vector<32x1xf32>
    %cst_8 = arith.constant dense<0.000000e+00> : vector<1x8xf32>
    %11 = tpu.matmul %9, %8, %cst_8 {dimension_numbers = #tpu.dot_dimension_numbers<[1], [0], [0], [1], [0, 0, 1, 1], [], []>} : vector<1x32xf32>, vector<32x8xf32>, vector<1x8xf32> -> vector<1x8xf32>
    %12 = vector.broadcast %11 : vector<1x8xf32> to vector<32x8xf32>
    %13 = arith.mulf %0, %12 : vector<32x8xf32>
    %14 = vector.broadcast %10 : vector<32x1xf32> to vector<32x8xf32>
    %15 = arith.addf %13, %14 : vector<32x8xf32>
    %16 = arith.addf %15, %8 : vector<32x8xf32>
    %c2 = arith.constant 2 : index
    %c0_9 = arith.constant 0 : index
    %17 = vector.load %arg2[%c2, %c0_9] : memref<3x32xf32, #tpu.memory_space<vmem>>, vector<1x32xf32>
    %c0_10 = arith.constant 0 : index
    %c2_11 = arith.constant 2 : index
    %18 = vector.load %arg3[%c0_10, %c2_11] : memref<32x3xf32, #tpu.memory_space<vmem>>, vector<32x1xf32>
    %cst_12 = arith.constant dense<0.000000e+00> : vector<1x8xf32>
    %19 = tpu.matmul %17, %16, %cst_12 {dimension_numbers = #tpu.dot_dimension_numbers<[1], [0], [0], [1], [0, 0, 1, 1], [], []>} : vector<1x32xf32>, vector<32x8xf32>, vector<1x8xf32> -> vector<1x8xf32>
    %20 = vector.broadcast %19 : vector<1x8xf32> to vector<32x8xf32>
    %21 = arith.mulf %0, %20 : vector<32x8xf32>
    %22 = vector.broadcast %18 : vector<32x1xf32> to vector<32x8xf32>
    %23 = arith.addf %21, %22 : vector<32x8xf32>
    %24 = arith.addf %23, %16 : vector<32x8xf32>
    %c0_13 = arith.constant 0 : index
    %c0_14 = arith.constant 0 : index
    %25 = vector.load %arg4[%c0_13, %c0_14] : memref<64x32xf32, #tpu.memory_space<vmem>>, vector<64x32xf32>
    %cst_15 = arith.constant dense<0.000000e+00> : vector<64x8xf32>
    %26 = tpu.matmul %25, %0, %cst_15 {dimension_numbers = #tpu.dot_dimension_numbers<[1], [0], [0], [1], [0, 0, 1, 1], [], []>} : vector<64x32xf32>, vector<32x8xf32>, vector<64x8xf32> -> vector<64x8xf32>
    %c0_16 = arith.constant 0 : index
    %c0_17 = arith.constant 0 : index
    %27 = vector.load %arg5[%c0_16, %c0_17] : memref<64x1xf32, #tpu.memory_space<vmem>>, vector<64x1xf32>
    %28 = vector.broadcast %27 : vector<64x1xf32> to vector<64x8xf32>
    %29 = arith.addf %26, %28 : vector<64x8xf32>
    %cst_18 = arith.constant 0.000000e+00 : f32
    %30 = vector.broadcast %cst_18 : f32 to vector<64x8xf32>
    %31 = arith.maximumf %29, %30 : vector<64x8xf32>
    %c0_19 = arith.constant 0 : index
    %c0_20 = arith.constant 0 : index
    %32 = vector.load %arg6[%c0_19, %c0_20] : memref<32x64xf32, #tpu.memory_space<vmem>>, vector<32x64xf32>
    %cst_21 = arith.constant dense<0.000000e+00> : vector<32x8xf32>
    %33 = tpu.matmul %32, %31, %cst_21 {dimension_numbers = #tpu.dot_dimension_numbers<[1], [0], [0], [1], [0, 0, 1, 1], [], []>} : vector<32x64xf32>, vector<64x8xf32>, vector<32x8xf32> -> vector<32x8xf32>
    %c0_22 = arith.constant 0 : index
    %c0_23 = arith.constant 0 : index
    %34 = vector.load %arg7[%c0_22, %c0_23] : memref<32x1xf32, #tpu.memory_space<vmem>>, vector<32x1xf32>
    %35 = vector.broadcast %34 : vector<32x1xf32> to vector<32x8xf32>
    %36 = arith.addf %33, %35 : vector<32x8xf32>
    %cst_24 = arith.constant 0.000000e+00 : f32
    %37 = vector.broadcast %cst_24 : f32 to vector<32x8xf32>
    %38 = arith.maximumf %36, %37 : vector<32x8xf32>
    %c0_25 = arith.constant 0 : index
    %c0_26 = arith.constant 0 : index
    %39 = vector.load %arg8[%c0_25, %c0_26] : memref<1x32xf32, #tpu.memory_space<vmem>>, vector<1x32xf32>
    %c0_27 = arith.constant 0 : index
    %c0_28 = arith.constant 0 : index
    %40 = vector.load %arg9[%c0_27, %c0_28] : memref<1x32xf32, #tpu.memory_space<vmem>>, vector<1x32xf32>
    %cst_29 = arith.constant dense<0.000000e+00> : vector<1x8xf32>
    %41 = tpu.matmul %39, %24, %cst_29 {dimension_numbers = #tpu.dot_dimension_numbers<[1], [0], [0], [1], [0, 0, 1, 1], [], []>} : vector<1x32xf32>, vector<32x8xf32>, vector<1x8xf32> -> vector<1x8xf32>
    %cst_30 = arith.constant dense<0.000000e+00> : vector<1x8xf32>
    %42 = tpu.matmul %40, %38, %cst_30 {dimension_numbers = #tpu.dot_dimension_numbers<[1], [0], [0], [1], [0, 0, 1, 1], [], []>} : vector<1x32xf32>, vector<32x8xf32>, vector<1x8xf32> -> vector<1x8xf32>
    %43 = arith.addf %41, %42 : vector<1x8xf32>
    %c0_31 = arith.constant 0 : index
    %c0_32 = arith.constant 0 : index
    %44 = vector.load %arg10[%c0_31, %c0_32] : memref<1x1xf32, #tpu.memory_space<vmem>>, vector<1x1xf32>
    %45 = vector.broadcast %44 : vector<1x1xf32> to vector<1x8xf32>
    %46 = arith.addf %43, %45 : vector<1x8xf32>
    %47 = arith.negf %46 : vector<1x8xf32>
    %48 = math.exp %47 : vector<1x8xf32>
    %cst_33 = arith.constant 1.000000e+00 : f32
    %49 = vector.broadcast %cst_33 : f32 to vector<1x8xf32>
    %50 = arith.addf %49, %48 : vector<1x8xf32>
    %51 = arith.divf %49, %50 : vector<1x8xf32>
    %c0_34 = arith.constant 0 : index
    %c0_35 = arith.constant 0 : index
    %52 = vector.load %arg11[%c0_34, %c0_35] : memref<1x8xf32, #tpu.memory_space<vmem>>, vector<1x8xf32>
    tpu.vector_store %arg11[%c0_34, %c0_35], %51 {strides = array<i32>} : memref<1x8xf32, #tpu.memory_space<vmem>>, vector<1x8xf32>,
    return
  }
  func.func @transform_0(%arg0: i32) -> (i32, i32) {
    %c0_i32 = arith.constant 0 : i32
    %c0_i32_0 = arith.constant 0 : i32
    return %c0_i32, %arg0 : i32, i32
  }
  func.func @transform_1(%arg0: i32) -> (i32, i32) {
    %c0_i32 = arith.constant 0 : i32
    %c0_i32_0 = arith.constant 0 : i32
    %c0_i32_1 = arith.constant 0 : i32
    return %c0_i32, %c0_i32_0 : i32, i32
  }
  func.func @transform_2(%arg0: i32) -> (i32, i32) {
    %c0_i32 = arith.constant 0 : i32
    %c0_i32_0 = arith.constant 0 : i32
    %c0_i32_1 = arith.constant 0 : i32
    return %c0_i32, %c0_i32_0 : i32, i32
  }
  func.func @transform_3(%arg0: i32) -> (i32, i32) {
    %c0_i32 = arith.constant 0 : i32
    %c0_i32_0 = arith.constant 0 : i32
    %c0_i32_1 = arith.constant 0 : i32
    return %c0_i32, %c0_i32_0 : i32, i32
  }
  func.func @transform_4(%arg0: i32) -> (i32, i32) {
    %c0_i32 = arith.constant 0 : i32
    %c0_i32_0 = arith.constant 0 : i32
    %c0_i32_1 = arith.constant 0 : i32
    return %c0_i32, %c0_i32_0 : i32, i32
  }
  func.func @transform_5(%arg0: i32) -> (i32, i32) {
    %c0_i32 = arith.constant 0 : i32
    %c0_i32_0 = arith.constant 0 : i32
    %c0_i32_1 = arith.constant 0 : i32
    return %c0_i32, %c0_i32_0 : i32, i32
  }
  func.func @transform_6(%arg0: i32) -> (i32, i32) {
    %c0_i32 = arith.constant 0 : i32
    %c0_i32_0 = arith.constant 0 : i32
    %c0_i32_1 = arith.constant 0 : i32
    return %c0_i32, %c0_i32_0 : i32, i32
  }
  func.func @transform_7(%arg0: i32) -> (i32, i32) {
    %c0_i32 = arith.constant 0 : i32
    %c0_i32_0 = arith.constant 0 : i32
    %c0_i32_1 = arith.constant 0 : i32
    return %c0_i32, %c0_i32_0 : i32, i32
  }
  func.func @transform_8(%arg0: i32) -> (i32, i32) {
    %c0_i32 = arith.constant 0 : i32
    %c0_i32_0 = arith.constant 0 : i32
    %c0_i32_1 = arith.constant 0 : i32
    return %c0_i32, %c0_i32_0 : i32, i32
  }
  func.func @transform_9(%arg0: i32) -> (i32, i32) {
    %c0_i32 = arith.constant 0 : i32
    %c0_i32_0 = arith.constant 0 : i32
    %c0_i32_1 = arith.constant 0 : i32
    return %c0_i32, %c0_i32_0 : i32, i32
  }
  func.func @transform_10(%arg0: i32) -> (i32, i32) {
    %c0_i32 = arith.constant 0 : i32
    %c0_i32_0 = arith.constant 0 : i32
    return %c0_i32, %arg0 : i32, i32
  }
}

</mosaic_0001>

<bundles_post_ra>
// kernel: tpu_custom_call.1
= control target key start
LH: loop header
LB: loop body
LE: loop exit
PB: predicated region body
PF: predicated region fallthrough
CT: control target
= control target key end

     0   :  { %s1407_s0 = inlined_call_operand.vmem [shape: f32[32,8], index: 0, kind: input, shape index: {}]   ;;  %s1408_s1 = inlined_call_operand.vmem [shape: f32[3,32], index: 1, kind: input, shape index: {}]   ;;  %s1409_s2 = inlined_call_operand.vmem [shape: f32[32,3], index: 2, kind: input, shape index: {}]   ;;  %s1410_s3 = inlined_call_operand.vmem [shape: f32[64,32], index: 3, kind: input, shape index: {}]   ;;  %s1411_s4 = inlined_call_operand.vmem [shape: f32[64,1], index: 4, kind: input, shape index: {}]   ;;  %s1412_s5 = inlined_call_operand.vmem [shape: f32[32,64], index: 5, kind: input, shape index: {}]   ;;  %s1413_s6 = inlined_call_operand.vmem [shape: f32[32,1], index: 6, kind: input, shape index: {}]   ;;  %s1414_s7 = inlined_call_operand.vmem [shape: f32[1,32], index: 7, kind: input, shape index: {}]   ;;  %s1415_s8 = inlined_call_operand.vmem [shape: f32[1,32], index: 8, kind: input, shape index: {}]   ;;  %s1416_s9 = inlined_call_operand.<no memory space> [shape: f32[1,1], index: 9, kind: input, shape index: {}]   ;;  %s1417_s10 = inlined_call_operand.hbm [shape: f32[1,8], index: 10, kind: output, shape index: {}]  }
   0x1   :  { %v15_v0 = vstv %s1416_s9 }
   0x2   :  { %16 = vst [vmem:[#allocation2] sm:$0x1] %v15_v0 }
   0x3   :  { %v1148_v1 = vld [vmem:[%s1407_s0 + $0x18] sm:$0xff]  ;;  %v1081_v2 = vmov 0.0   ;;  %v1154_v3 = vld [vmem:[%s1407_s0 + $0x10] sm:$0xff]  ;;  %vm1082_vm0 = vmmov 0   ;;  %v1083_v5 = vmov 0   ;;  %v1168_v6 = vld [vmem:[%s1409_s2 + $0x8] sm:$0xff] }
   0x4   :  { %940 = vmatprep.subr.mxu0 %v1081_v2  ;;  %948 = vmatprep.mubr.msk.f32.mxu0 %vm1082_vm0, %v1081_v2  ;;  %v1161_v4 = vld [vmem:[%s1409_s2 + $0x18] sm:$0xff]  ;;  %v1174_v7 = vld [vmem:[%s1407_s0 + $0x8] sm:$0xff] }
   0x5   :  { %941 = vmatpush3.msra.mxu0 %v1148_v1  ;;  %1043 = vset.pattern.permute.xlu0 %v1083_v5 }
   0x6   :  { %942 = vmatprep.subr.mxu0 %v1081_v2  ;;  %146 = vperm.xlu0 %1043, %v1161_v4  }
   0x7   :  { %17 = vsyncpa [#allocation4], 0  ;;  %943 = vmatpush3.msra.mxu0 %v1154_v3  ;;  %1044 = vset.pattern.permute.xlu1 %v1083_v5  ;;  %v1182_v8 = vld [vmem:[%s1409_s2 + $0x10] sm:$0xff]  ;;  %v1188_v9 = vld [vmem:[%s1407_s0] sm:$0xff]  ;;  %vm47_vm1 = vcmask 261120   ;;  %v1084_v12 = vmov 1   ;;  %v121_v22 = vlaneseq }
   0x8   :  { %944 = vmatprep.subr.mxu0 %v1081_v2  ;;  %136 = vperm.xlu1 %1044, %v1168_v6   ;;  %v42_v10 = vld [vmem:[%s1408_s1] sm:$0x1]  ;;  %v384_v13 = vld [vmem:[%s1411_s4 + $0x38] sm:$0xff]  ;;  %v383_v14 = vld [vmem:[%s1411_s4 + $0x30] sm:$0xff]  ;;  %v1085_v53 = vmov 2   ;;  %vm590_vm2 = vcmask 523264  }
   0x9   :  { %945 = vmatpush3.msra.mxu0 %v1174_v7  ;;  %v1198_v11 = vld [vmem:[%s1409_s2] sm:$0xff]  ;;  %951 = vmatprep.subr.mxu1 %v1081_v2  ;;  %v382_v15 = vld [vmem:[%s1411_s4 + $0x28] sm:$0xff]  ;;  %v380_v16 = vld [vmem:[%s1411_s4 + $0x18] sm:$0xff]  ;;  %v122_v23 = vshrl.u32 %v121_v22, 7  ;;  %vm857_vm3 = vcmask 57344  }
   0xa   :  { %946 = vmatprep.subr.mxu0 %v1081_v2  ;;  %141 = vperm.xlu0 %1043, %v1182_v8   ;;  %v381_v17 = vld [vmem:[%s1411_s4 + $0x20] sm:$0xff]  ;;  %v378_v18 = vld [vmem:[%s1411_s4 + $0x8] sm:$0xff]  ;;  %v379_v19 = vld [vmem:[%s1411_s4 + $0x10] sm:$0xff] }
   0xb   :  { %947 = vmatpush3.msra.mxu0 %v1188_v9  ;;  %959 = vmatprep.mubr.msk.f32.mxu1 %vm1082_vm0, %v1081_v2  ;;  %v377_v20 = vld [vmem:[%s1411_s4] sm:$0xff]  ;;  %v569_v21 = vld [vmem:[%s1413_s6 + $0x18] sm:$0xff]  ;;  %v1244_v24 = vsub.s32 0, %v122_v23  ;;  %v370_v46 = vld [vmem:[%s1410_s3 + $0x8] sm:$0xff] }
   0xc   :  { %949 = vmatmul.mubr.msk.f32.vlgmr.msra.gmra.mxu0 %vm47_vm1, %v42_v10  ;;  %131 = vperm.xlu1 %1044, %v1198_v11   ;;  %v157_v44 = vld [vmem:[%s1408_s1 + $0x1] sm:$0x1]  ;;  %v371_v47 = vld [vmem:[%s1410_s3 + $0x10] sm:$0xff]  ;;  %v372_v48 = vld [vmem:[%s1410_s3 + $0x18] sm:$0xff] }
   0xd   :  { %962 = vmatprep.subr.mxu0 %v1081_v2  ;;  %970 = vmatprep.mubr.msk.f32.mxu0 %vm1082_vm0, %v1081_v2  ;;  %v369_v45 = vld [vmem:[%s1410_s3] sm:$0xff]  ;;  %v374_v50 = vld [vmem:[%s1410_s3 + $0x28] sm:$0xff]  ;;  %v375_v51 = vld [vmem:[%s1410_s3 + $0x30] sm:$0xff] }
   0xe   :  { %1045 = vset.pattern.permute.xlu0 %v1084_v12  ;;  %v373_v49 = vld [vmem:[%s1410_s3 + $0x20] sm:$0xff]  ;;  %v376_v52 = vld [vmem:[%s1410_s3 + $0x38] sm:$0xff]  ;;  %v568_v54 = vld [vmem:[%s1413_s6 + $0x10] sm:$0xff] }
   0xf   :  { %252 = vperm.xlu0 %1045, %v1161_v4   ;;  %v567_v55 = vld [vmem:[%s1413_s6 + $0x8] sm:$0xff]  ;;  %v566_v56 = vld [vmem:[%s1413_s6] sm:$0xff] }
  0x10   :  { %1046 = vset.pattern.permute.xlu1 %v1084_v12  ;;  %v840_v57 = vld [vmem:[#allocation2] sm:$0x1]  ;;  %v263_v23 = vld [vmem:[%s1408_s1 + $0x2] sm:$0x1] }
  0x11   :  { %248 = vperm.xlu1 %1046, %v1182_v8  }
  0x13   :  { %240 = vperm.xlu0 %1045, %v1198_v11  }
  0x15   :  { %244 = vperm.xlu1 %1046, %v1168_v6  }
  0x17   :  { %1048 = vset.pattern.permute.xlu0 %v1083_v5 }
  0x18   :  { %417 = vperm.xlu0 %1048, %v383_v14  }
  0x19   :  { %1047 = vset.pattern.permute.xlu1 %v1083_v5 }
  0x1a   :  { %422 = vperm.xlu1 %1047, %v384_v13  }
  0x1c   :  { %402 = vperm.xlu0 %1048, %v380_v16  }
  0x1e   :  { %412 = vperm.xlu1 %1047, %v382_v15  }
  0x20   :  { %392 = vperm.xlu0 %1048, %v378_v18  }
  0x22   :  { %407 = vperm.xlu1 %1047, %v381_v17  }
  0x24   :  { %1049 = vset.pattern.permute.xlu0 %v1085_v53 }
  0x25   :  { %358 = vperm.xlu0 %1049, %v1161_v4  }
  0x26   :  { %397 = vperm.xlu1 %1047, %v379_v19  }
  0x29   :  { %1051 = vset.pattern.permute.xlu0 %v1083_v5 }
  0x2a   :  { %387 = vperm.xlu1 %1047, %v377_v20   ;;  %582 = vperm.xlu0 %1051, %v568_v54   ;;  %v564_v54 = vld [vmem:[%s1412_s5 + $0x10] sm:$0xff] }
  0x2e   :  { %587 = vperm.xlu1 %1047, %v569_v21   ;;  %1053 = vset.pattern.permute.xlu0 %v1085_v53 }
  0x2f   :  { %346 = vperm.xlu0 %1053, %v1198_v11  }
  0x32   :  { %1050 = vset.pattern.permute.xlu1 %v1085_v53  ;;  %v563_v53 = vld [vmem:[%s1412_s5 + $0x8] sm:$0xff] }
  0x33   :  { %354 = vperm.xlu1 %1050, %v1182_v8   ;;  %1054 = vset.pattern.permute.xlu0 %v1083_v5 }
  0x37   :  { %350 = vperm.xlu1 %1050, %v1168_v6  }
  0x3b   :  { %1052 = vset.pattern.permute.xlu1 %v1083_v5 }
  0x3c   :  { %577 = vperm.xlu1 %1052, %v567_v55   ;;  %v565_v55 = vld [vmem:[%s1412_s5 + $0x18] sm:$0xff] }
  0x40   :  { %572 = vperm.xlu1 %1052, %v566_v56  }
  0x44   :  { %843 = vperm.xlu1 %1052, %v840_v57  }
  0x81   :  { %v147_v25 = vpop.permute.xlu0 %146 }
  0x83   :  { %v137_v26 = vpop.permute.xlu1 %136 }
  0x85   :  { %v142_v33 = vpop.permute.xlu0 %141 }
  0x87   :  { %v132_v37 = vpop.permute.xlu1 %131 }
  0x8a   :  { %v253_v62 = vpop.permute.xlu0 %252 }
  0x8c   :  { %v249_v58 = vpop.permute.xlu1 %248 }
  0x8e   :  { %v241_v14 = vpop.permute.xlu0 %240 }
  0x90   :  { %v245_v59 = vpop.permute.xlu1 %244 }
  0x95   :  { %v423_v12 = vpop.permute.xlu1 %422 }
  0x99   :  { %v413_v20 = vpop.permute.xlu1 %412 }
  0xcc   :  { %v117_v27 = vpop.f32.mrf.mxu0 }
  0xcd   :  { %v124_v28 = vrot.slane %v117_v27, %v1244_v24  ;;  %v418_v27 = vpop.permute.xlu0 %417 }
  0xce   :  { %v950_v29 = vpop.f32.mrf.mxu0 }
  0xcf   :  { %v127_v30 = vmul.f32 %v124_v28, %v1154_v3  ;;  %v128_v31 = vmul.f32 %v124_v28, %v1148_v1  ;;  %v126_v32 = vmul.f32 %v124_v28, %v1174_v7  ;;  %v125_v35 = vmul.f32 %v124_v28, %v1188_v9  ;;  %v408_v29 = vpop.permute.xlu1 %407 }
  0xd1   :  { %v151_v34 = vadd.f32 %v142_v33, %v127_v30  ;;  %v152_v36 = vadd.f32 %v147_v25, %v128_v31  ;;  %v150_v39 = vadd.f32 %v137_v26, %v126_v32  ;;  %v149_v41 = vadd.f32 %v132_v37, %v125_v35  ;;  %v562_v26 = vld [vmem:[%s1412_s5] sm:$0xff]  ;;  %v403_v33 = vpop.permute.xlu0 %402 }
  0xd3   :  { %v1252_v38 = vadd.f32 %v152_v36, %v1148_v1  ;;  %v1255_v40 = vadd.f32 %v151_v34, %v1154_v3  ;;  %v1261_v42 = vadd.f32 %v150_v39, %v1174_v7  ;;  %v1265_v43 = vadd.f32 %v149_v41, %v1188_v9 }
  0xd5   :  { %952 = vmatpush3.msra.mxu1 %v1252_v38 }
  0xd6   :  { %953 = vmatprep.subr.mxu1 %v1081_v2 }
  0xd7   :  { %954 = vmatpush3.msra.mxu1 %v1255_v40 }
  0xd8   :  { %955 = vmatprep.subr.mxu1 %v1081_v2 }
  0xd9   :  { %956 = vmatpush3.msra.mxu1 %v1261_v42 }
  0xda   :  { %957 = vmatprep.subr.mxu1 %v1081_v2 }
  0xdb   :  { %958 = vmatpush3.msra.mxu1 %v1265_v43 }
  0xdc   :  { %960 = vmatmul.mubr.msk.f32.vlgmr.msra.gmra.mxu1 %vm47_vm1, %v157_v44  ;;  %973 = vmatprep.subr.mxu1 %v1148_v1 }
  0xdd   :  { %974 = vmatpush3.msra.mxu1 %v1148_v1  ;;  %981 = vmatprep.mubr.msk.f32.mxu1 %vm47_vm1, %v369_v45 }
  0xde   :  { %975 = vmatprep.subr.mxu1 %v1154_v3 }
  0xdf   :  { %976 = vmatpush3.msra.mxu1 %v1154_v3 }
  0xe0   :  { %977 = vmatprep.subr.mxu1 %v1174_v7 }
  0xe1   :  { %978 = vmatpush3.msra.mxu1 %v1174_v7 }
  0xe2   :  { %979 = vmatprep.subr.mxu1 %v1188_v9 }
  0xe3   :  { %980 = vmatpush3.msra.mxu1 %v1188_v9 }
  0xe4   :  { %982 = vmatmul.mubr.msk.f32.vlgmr.msra.gmra.mxu1 %vm47_vm1, %v370_v46  ;;  %1015 = vmatprep.subr.mxu1 %v1081_v2 }
  0xe5   :  { %984 = vmatprep.mubr.msk.f32.mxu1 %vm47_vm1, %v371_v47 }
  0xe8   :  { %985 = vmatmul.mubr.msk.f32.gmra.mxu1 %vm47_vm1, %v372_v48 }
  0xe9   :  { %987 = vmatprep.mubr.msk.f32.mxu1 %vm47_vm1, %v373_v49 }
  0xec   :  { %988 = vmatmul.mubr.msk.f32.gmra.mxu1 %vm47_vm1, %v374_v50 }
  0xed   :  { %990 = vmatprep.mubr.msk.f32.mxu1 %vm47_vm1, %v375_v51 }
  0xf0   :  { %991 = vmatmul.mubr.msk.f32.gmra.mxu1 %vm47_vm1, %v376_v52 }
  0xf1   :  { %1023 = vmatprep.mubr.msk.f32.mxu1 %vm1082_vm0, %v1081_v2 }
 0x19c   :  { %v227_v60 = vpop.f32.mrf.mxu1 }
 0x19d   :  { %v234_v61 = vrot.slane %v227_v60, %v1244_v24 }
 0x19e   :  { %v961_v63 = vpop.f32.mrf.mxu1 }
 0x19f   :  { %v236_v0 = vmul.f32 %v234_v61, %v1174_v7  ;;  %v237_v4 = vmul.f32 %v234_v61, %v1154_v3  ;;  %v238_v6 = vmul.f32 %v234_v61, %v1148_v1  ;;  %v235_v8 = vmul.f32 %v234_v61, %v1188_v9 }
 0x1a1   :  { %v258_v10 = vadd.f32 %v253_v62, %v238_v6  ;;  %v257_v11 = vadd.f32 %v249_v58, %v237_v4  ;;  %v256_v13 = vadd.f32 %v245_v59, %v236_v0  ;;  %v255_v17 = vadd.f32 %v241_v14, %v235_v8 }
 0x1a3   :  { %v1339_v5 = vadd.f32 %v258_v10, %v1252_v38  ;;  %v1343_v16 = vadd.f32 %v257_v11, %v1255_v40  ;;  %v1348_v19 = vadd.f32 %v256_v13, %v1261_v42  ;;  %v1353_v22 = vadd.f32 %v255_v17, %v1265_v43  ;;  %v398_v38 = vpop.permute.xlu1 %397  ;;  %v393_v43 = vpop.permute.xlu0 %392 }
 0x1a4   :  { %v983_v15 = vpop.f32.mrf.mxu1 }
 0x1a5   :  { %963 = vmatpush3.msra.mxu0 %v1339_v5  ;;  %v521_v47 = vadd.f32 %v983_v15, %v393_v43 }
 0x1a6   :  { %964 = vmatprep.subr.mxu0 %v1081_v2  ;;  %v515_v18 = vpop.f32.mrf.mxu1 }
 0x1a7   :  { %965 = vmatpush3.msra.mxu0 %v1343_v16  ;;  %v388_v46 = vpop.permute.xlu1 %387  ;;  %v555_v51 = vmax.f32 %v521_v47, 0.0  ;;  %v359_v57 = vpop.permute.xlu0 %358 }
 0x1a8   :  { %966 = vmatprep.subr.mxu0 %v1081_v2  ;;  %v986_v21 = vpop.f32.mrf.mxu1  ;;  %v516_v49 = vadd.f32 %v515_v18, %v388_v46 }
 0x1a9   :  { %967 = vmatpush3.msra.mxu0 %v1348_v19  ;;  %v531_v41 = vadd.f32 %v986_v21, %v403_v33 }
 0x1aa   :  { %968 = vmatprep.subr.mxu0 %v1081_v2  ;;  %v525_v25 = vpop.f32.mrf.mxu1  ;;  %v554_v52 = vmax.f32 %v516_v49, 0.0 }
 0x1ab   :  { %969 = vmatpush3.msra.mxu0 %v1353_v22  ;;  %v526_v44 = vadd.f32 %v525_v25, %v398_v38  ;;  %v557_v48 = vmax.f32 %v531_v41, 0.0  ;;  %v588_v56 = vpop.permute.xlu1 %587  ;;  %v583_v59 = vpop.permute.xlu0 %582 }
 0x1ac   :  { %971 = vmatmul.mubr.msk.f32.vlgmr.msra.gmra.mxu0 %vm47_vm1, %v263_v23  ;;  %v989_v28 = vpop.f32.mrf.mxu1 }
 0x1ad   :  { %1009 = vmatprep.mubr.msk.f32.mxu0 %vm590_vm2, %v562_v26  ;;  %v541_v35 = vadd.f32 %v989_v28, %v413_v20  ;;  %v556_v50 = vmax.f32 %v526_v44, 0.0 }
 0x1ae   :  { %v535_v30 = vpop.f32.mrf.mxu1 }
 0x1af   :  { %v536_v39 = vadd.f32 %v535_v30, %v408_v29  ;;  %v559_v42 = vmax.f32 %v541_v35, 0.0  ;;  %v355_v58 = vpop.permute.xlu1 %354  ;;  %v693_v30 = vld [vmem:[%s1415_s8] sm:$0x1]  ;;  %s1086_s8 = smov [#allocation3]  }
 0x1b0   :  { %v992_v31 = vpop.f32.mrf.mxu1  ;;  %s865_s13 = sshll.u32 %s1086_s8, 4  ;;  %s866_s13 = int_to_ptr.vmem [resolvable:$true] %s865_s13 }
 0x1b1   :  { %v551_v32 = vadd.f32 %v992_v31, %v423_v12  ;;  %v558_v45 = vmax.f32 %v536_v39, 0.0  ;;  %v347_v12 = vpop.permute.xlu0 %346  ;;  %s1059_s14 = scalar_lea.vmem %s866_s13, 16  ;;  %s1063_s15 = scalar_lea.vmem %s866_s13, 32 }
 0x1b2   :  { %v545_v34 = vpop.f32.mrf.mxu1  ;;  %p1060_p0 = scmp.ne.s32.totalorder %s866_s13, %s1059_s14  ;;  %p1064_p1 = scmp.lt.s32.totalorder %s866_s13, %s866_s13 }
 0x1b3   :  { %v561_v36 = vmax.f32 %v551_v32, 0.0  ;;  %v546_v37 = vadd.f32 %v545_v34, %v418_v27  ;;  %v351_v6 = vpop.permute.xlu1 %350  ;;  %p1065_p2 = scmp.lt.s32.totalorder %s1063_s15, %s1059_s14 }
 0x1b5   :  { %v560_v40 = vmax.f32 %v546_v37, 0.0  ;;  %993 = vmatprep.subr.mxu0 %v561_v36  ;;  %p1066_p3 = por %p1065_p2, %p1064_p1 }
 0x1b6   :  { %994 = vmatpush3.msra.mxu0 %v561_v36 }
 0x1b7   :  { %995 = vmatprep.subr.mxu0 %v560_v40  ;;  %p1067_p4 = pnand %p1066_p3, %p1060_p0 }
 0x1b8   :  { %996 = vmatpush3.msra.mxu0 %v560_v40 }
 0x1b9   :  { %997 = vmatprep.subr.mxu0 %v559_v42 }
 0x1ba   :  { %998 = vmatpush3.msra.mxu0 %v559_v42 }
 0x1bb   :  { %999 = vmatprep.subr.mxu0 %v558_v45 }
 0x1bc   :  { %1000 = vmatpush3.msra.mxu0 %v558_v45 }
 0x1bd   :  { %1001 = vmatprep.subr.mxu0 %v557_v48 }
 0x1be   :  { %1002 = vmatpush3.msra.mxu0 %v557_v48 }
 0x1bf   :  { %1003 = vmatprep.subr.mxu0 %v556_v50 }
 0x1c0   :  { %1004 = vmatpush3.msra.mxu0 %v556_v50 }
 0x1c1   :  { %1005 = vmatprep.subr.mxu0 %v555_v51 }
 0x1c2   :  { %1006 = vmatpush3.msra.mxu0 %v555_v51 }
 0x1c3   :  { %1007 = vmatprep.subr.mxu0 %v554_v52 }
 0x1c4   :  { %1008 = vmatpush3.msra.mxu0 %v554_v52 }
 0x1c5   :  { %1010 = vmatmul.mubr.msk.f32.vlgmr.msra.gmra.mxu0 %vm590_vm2, %v563_v53  ;;  %1026 = vmatprep.subr.mxu0 %v1081_v2 }
 0x1c6   :  { %1012 = vmatprep.mubr.msk.f32.mxu0 %vm590_vm2, %v564_v54 }
 0x1c9   :  { %1013 = vmatmul.mubr.msk.f32.gmra.mxu0 %vm590_vm2, %v565_v55 }
 0x1ca   :  { %1034 = vmatprep.mubr.msk.f32.mxu0 %vm1082_vm0, %v1081_v2 }
 0x26c   :  { %v333_v60 = vpop.f32.mrf.mxu0 }
 0x26d   :  { %v340_v61 = vrot.slane %v333_v60, %v1244_v24 }
 0x26e   :  { %v972_v62 = vpop.f32.mrf.mxu0 }
 0x26f   :  { %v343_v63 = vmul.f32 %v340_v61, %v1154_v3  ;;  %v344_v0 = vmul.f32 %v340_v61, %v1148_v1  ;;  %v342_v4 = vmul.f32 %v340_v61, %v1174_v7  ;;  %v341_v8 = vmul.f32 %v340_v61, %v1188_v9  ;;  %v692_v7 = vld [vmem:[%s1414_s7] sm:$0x1]  ;;  %v578_v9 = vpop.permute.xlu1 %577 }
 0x271   :  { %v364_v10 = vadd.f32 %v359_v57, %v344_v0  ;;  %v363_v11 = vadd.f32 %v355_v58, %v343_v63  ;;  %v362_v13 = vadd.f32 %v351_v6, %v342_v4  ;;  %v361_v15 = vadd.f32 %v347_v12, %v341_v8 }
 0x273   :  { %v368_v14 = vadd.f32 %v364_v10, %v1339_v5  ;;  %v367_v17 = vadd.f32 %v363_v11, %v1343_v16  ;;  %v366_v3 = vadd.f32 %v362_v13, %v1348_v19  ;;  %v365_v1 = vadd.f32 %v361_v15, %v1353_v22  ;;  %v573_v20 = vpop.permute.xlu1 %572 }
 0x275   :  { %1027 = vmatpush3.msra.mxu0 %v368_v14 }
 0x276   :  { %1028 = vmatprep.subr.mxu0 %v1081_v2 }
 0x277   :  { %1029 = vmatpush3.msra.mxu0 %v367_v17  ;;  %v844_v33 = vpop.permute.xlu1 %843 }
 0x278   :  { %1030 = vmatprep.subr.mxu0 %v1081_v2  ;;  %v849_v35 = vrot.slane %v844_v33, %v1244_v24 }
 0x279   :  { %1031 = vmatpush3.msra.mxu0 %v366_v3 }
 0x27a   :  { %1032 = vmatprep.subr.mxu0 %v1081_v2 }
 0x27b   :  { %1033 = vmatpush3.msra.mxu0 %v365_v1 }
 0x27c   :  { %1035 = vmatmul.mubr.msk.f32.vlgmr.msra.gmra.mxu0 %vm47_vm1, %v692_v7 }
 0x285   :  { %v1011_v5 = vpop.f32.mrf.mxu0 }
 0x286   :  { %v675_v23 = vadd.f32 %v1011_v5, %v578_v9 }
 0x287   :  { %v669_v16 = vpop.f32.mrf.mxu0 }
 0x288   :  { %v670_v26 = vadd.f32 %v669_v16, %v573_v20  ;;  %v689_v28 = vmax.f32 %v675_v23, 0.0 }
 0x289   :  { %v1014_v18 = vpop.f32.mrf.mxu0 }
 0x28a   :  { %v685_v19 = vadd.f32 %v1014_v18, %v588_v56  ;;  %v688_v29 = vmax.f32 %v670_v26, 0.0 }
 0x28b   :  { %v679_v21 = vpop.f32.mrf.mxu0 }
 0x28c   :  { %v691_v25 = vmax.f32 %v685_v19, 0.0  ;;  %v680_v22 = vadd.f32 %v679_v21, %v583_v59 }
 0x28e   :  { %v690_v27 = vmax.f32 %v680_v22, 0.0  ;;  %1016 = vmatpush3.msra.mxu1 %v691_v25 }
 0x28f   :  { %1017 = vmatprep.subr.mxu1 %v1081_v2 }
 0x290   :  { %1018 = vmatpush3.msra.mxu1 %v690_v27 }
 0x291   :  { %1019 = vmatprep.subr.mxu1 %v1081_v2 }
 0x292   :  { %1020 = vmatpush3.msra.mxu1 %v689_v28 }
 0x293   :  { %1021 = vmatprep.subr.mxu1 %v1081_v2 }
 0x294   :  { %1022 = vmatpush3.msra.mxu1 %v688_v29 }
 0x295   :  { %1024 = vmatmul.mubr.msk.f32.vlgmr.msra.gmra.mxu1 %vm47_vm1, %v693_v30 }
 0x33c   :  { %v836_v31 = vpop.f32.mrf.mxu0 }
 0x33e   :  { %v1036_v32 = vpop.f32.mrf.mxu0 }
 0x355   :  { %v763_v34 = vpop.f32.mrf.mxu1 }
 0x356   :  { %v837_v36 = vadd.f32 %v836_v31, %v763_v34 }
 0x357   :  { %v1025_v37 = vpop.f32.mrf.mxu1 }
 0x358   :  { %v850_v38 = vadd.f32 %v849_v35, %v837_v36 }
 0x35a   :  { %v890_v39 = vmul.f32 -1.442695, %v850_v38 }
 0x35c   :  { %1055 = vpow2.f32 %v890_v39 }
 0x369   :  { %v1056_v40 = vpop.eup %1055 }
 0x36a   :  { %v854_v41 = vadd.f32 1.0, %v1056_v40 }
 0x36c   :  { %1057 = vrcp.f32 %v854_v41 }
 0x379   :  { %v1058_v2 = vpop.eup %1057 }
 0x37a   :  { %858 = vst.msk [vmem:[#allocation3] sm:$0x1] %vm857_vm3, %v1058_v2 }
 0x37b   :  { %1070 = shalt.err (!%p1067_p4)
}
 0x37c   :  { %868 = dma.vmem_to_hbm [thread:$0]  %s866_s13, 16, %s1417_s10, [#allocation4]  }
 0x37d   :  { %1079 = dma.done.wait [#allocation4], 16  }
 0x37e   :  { %1080 = vsyncadd [#allocation4], 4294967280 }
 0x37f   :  { %872 = vsyncpa [#allocation4], 1 }

</bundles_post_ra>
